<compile_context>
chip_gen: v5e
topology: v5e:2x2
jax: 0.10.0
libtpu: 0.0.40
codegen_flags: <defaults>
</compile_context>

<pallas_src>
import jax
import jax.numpy as jnp
from jax.experimental import pallas as pl
from jax.experimental.pallas import tpu as pltpu


def _round_up(x, m):
    return ((x + m - 1) // m) * m


def _vmem_capacity_bytes():
    """Physical VMEM per TensorCore; conservative fallback if the query fails."""
    try:
        cap = getattr(pltpu.get_tpu_info(), "vmem_capacity_bytes", None)
        if cap:
            return int(cap)
    except Exception:
        pass
    return 64 * 1024 * 1024  # v7x per-TC size: safe lower bound for all generations


def _plan_tiles(rows, D, H, L, in_item, w_item, out_item, vmem_cap):
    """Pick (row tile tm, hidden tile th, vmem_limit) so the working set fits in VMEM."""
    budget = int(vmem_cap * 0.6)          # headroom for Mosaic internal scratch
    D_l = _round_up(D, 128)
    L_l = _round_up(L, 128)

    def weight_bytes(th):
        th_l = _round_up(th, 128)
        blk = (_round_up(D, 8) * th_l * w_item      # W1 block
               + 8 * th_l * w_item                  # b1 block (sublane/lane padded)
               + _round_up(th, 8) * L_l * w_item    # W2 block
               + 8 * L_l * w_item)                  # b2 block
        return 2 * blk                              # default double buffering

    def per_row_bytes(th):
        th_l = _round_up(th, 128)
        return (2 * D_l * in_item       # x tile (double-buffered)
                + 2 * L_l * out_item    # output tile (double-buffered)
                + th_l * 4              # f32 hidden intermediate
                + th_l * w_item         # hidden cast before 2nd matmul
                + 3 * L_l * 4)          # f32 accumulator + dot temp + pre-cast out

    # Hidden tile: keep whole H resident if it fits next to a modest row tile, else halve.
    th = H
    tm_floor = min(_round_up(rows, 8), 256)
    while th > 128 and weight_bytes(th) + tm_floor * per_row_bytes(th) > budget:
        th = max(128, _round_up(th // 2, 128))

    # Row tile: biggest that fits; large tiles amortize the ~0.35 us/grid-step fixed cost.
    tm_cap = 2048 if vmem_cap >= 96 * 1024 * 1024 else 1024
    if D_l <= 256:                        # tiny rows: step-overhead / HBM bound, go bigger
        tm_cap *= 2
    avail = budget - weight_bytes(th)
    tm = min(max(avail, 0) // per_row_bytes(th), tm_cap, _round_up(rows, 8))
    tm = max(8, (tm // 8) * 8)

    est = weight_bytes(th) + tm * per_row_bytes(th) + (2 << 20)
    vmem_limit = int(min(int(0.75 * vmem_cap), max(2 * est, 32 * 1024 * 1024)))
    return tm, th, vmem_limit


def _mate_head_kernel(x_ref, w1_ref, b1_ref, w2_ref, b2_ref, o_ref, acc_ref):
    # x_ref: (tm, D)   w1_ref: (D, th)   b1_ref: (1, th) f32
    # w2_ref: (th, L)  b2_ref: (1, L) f32   o_ref: (tm, L)   acc_ref: (tm, L) f32
    j = pl.program_id(1)

    @pl.when(j == 0)
    def _():
        acc_ref[...] = jnp.zeros_like(acc_ref)

    h = jnp.dot(x_ref[...], w1_ref[...], preferred_element_type=jnp.float32)
    h = jnp.maximum(h + b1_ref[...], 0.0)          # bias + ReLU on the VPU, f32
    h = h.astype(w2_ref.dtype)                     # MXU-native dtype for 2nd matmul
    acc_ref[...] += jnp.dot(h, w2_ref[...], preferred_element_type=jnp.float32)

    @pl.when(j == pl.num_programs(1) - 1)
    def _():
        o_ref[...] = (acc_ref[...] + b2_ref[...]).astype(o_ref.dtype)


def mate_head_forward(seq_features, w1, b1, w2, b2, *, compute_dtype=None):
    """seq_features: (B, S, D) -> logits (B, S, L).  Dropout is identity (eval mode)."""
    B, S, D = seq_features.shape
    H = w1.shape[1]
    L = w2.shape[1]
    rows = B * S

    out_dtype = seq_features.dtype
    cdt = jnp.dtype(compute_dtype) if compute_dtype is not None else jnp.dtype(out_dtype)

    tm, th, vmem_limit = _plan_tiles(
        rows, D, H, L,
        in_item=cdt.itemsize, w_item=cdt.itemsize,
        out_item=jnp.dtype(out_dtype).itemsize,
        vmem_cap=_vmem_capacity_bytes())

    # Activations: flat (rows, D), lane-major, NO row padding (ragged last block is masked).
    x2d = seq_features.reshape(rows, D).astype(cdt)

    # Weights (tiny vs activations): cast to compute dtype; zero-pad H only if it is tiled
    # (padded hidden units give relu(0)=0 -> zero contribution, so the reduction is exact).
    w1c = w1.astype(cdt)
    w2c = w2.astype(cdt)
    b1f = b1.astype(jnp.float32)
    b2f = b2.astype(jnp.float32)
    H_pad = _round_up(H, th)
    if H_pad != H:
        w1c = jnp.pad(w1c, ((0, 0), (0, H_pad - H)))
        b1f = jnp.pad(b1f, ((0, H_pad - H),))
        w2c = jnp.pad(w2c, ((0, H_pad - H), (0, 0)))
    n_h = H_pad // th

    b1_2d = b1f.reshape(1, H_pad)
    b2_2d = b2f.reshape(1, L)

    grid = (pl.cdiv(rows, tm), n_h)

    out2d = pl.pallas_call(
        _mate_head_kernel,
        out_shape=jax.ShapeDtypeStruct((rows, L), out_dtype),
        grid_spec=pltpu.PrefetchScalarGridSpec(
            num_scalar_prefetch=0,
            grid=grid,
            in_specs=[
                pl.BlockSpec((tm, D), lambda i, j: (i, 0)),      # row tile of x
                pl.BlockSpec((D, th), lambda i, j: (0, j)),      # W1 hidden tile
                pl.BlockSpec((1, th), lambda i, j: (0, j)),      # b1 hidden tile (f32)
                pl.BlockSpec((th, L), lambda i, j: (j, 0)),      # W2 hidden tile
                pl.BlockSpec((1, L), lambda i, j: (0, 0)),       # b2 (f32)
            ],
            out_specs=pl.BlockSpec((tm, L), lambda i, j: (i, 0)),  # unpadded -> minimal writeback
            scratch_shapes=[pltpu.VMEM((tm, L), jnp.float32)],     # f32 logits accumulator
        ),
        compiler_params=pltpu.CompilerParams(
            dimension_semantics=("parallel", "arbitrary"),
            vmem_limit_bytes=vmem_limit,
        ),
    )(x2d, w1c, b1_2d, w2c, b2_2d)

    return out2d.reshape(B, S, L)


def reference_forward(seq_features, w1, b1, w2, b2):
    h = jnp.maximum(seq_features @ w1 + b1, 0.0)
    return h @ w2 + b2


if __name__ == "__main__":
    # Small, MATEHead-consistent shapes.
    batch, seq_len, input_dim = 2, 8, 32
    hidden_dim = input_dim          # MATEHead default: hidden_dim = input_dim
    num_labels = 4

    key = jax.random.PRNGKey(0)
    k_x, k_w1, k_b1, k_w2, k_b2, k_x2 = jax.random.split(key, 6)

    seq_features = jax.random.normal(k_x, (batch, seq_len, input_dim), dtype=jnp.float32)

    # Deterministic "Linear" parameters (uniform like torch's default init scale).
    lim1 = 1.0 / (input_dim ** 0.5)
    w1 = jax.random.uniform(k_w1, (input_dim, hidden_dim), minval=-lim1, maxval=lim1, dtype=jnp.float32)
    b1 = jax.random.uniform(k_b1, (hidden_dim,), minval=-lim1, maxval=lim1, dtype=jnp.float32)
    lim2 = 1.0 / (hidden_dim ** 0.5)
    w2 = jax.random.uniform(k_w2, (hidden_dim, num_labels), minval=-lim2, maxval=lim2, dtype=jnp.float32)
    b2 = jax.random.uniform(k_b2, (num_labels,), minval=-lim2, maxval=lim2, dtype=jnp.float32)

    ref = reference_forward(seq_features, w1, b1, w2, b2)

    # 1) f32 path.
    logits = jax.block_until_ready(mate_head_forward(seq_features, w1, b1, w2, b2))
    assert logits.shape == (batch, seq_len, num_labels)
    assert jnp.allclose(logits, ref, atol=1e-5, rtol=1e-5)

    # 2) Ragged row count (B*S not a multiple of 8/tm) -> exercises the masked last block.
    seq_ragged = jax.random.normal(k_x2, (3, 5, input_dim), dtype=jnp.float32)
    logits_r = jax.block_until_ready(mate_head_forward(seq_ragged, w1, b1, w2, b2))
    ref_r = reference_forward(seq_ragged, w1, b1, w2, b2)
    assert jnp.allclose(logits_r, ref_r, atol=1e-5, rtol=1e-5)

    # 3) bf16 MXU-native compute path (f32 accumulation), looser tolerance.
    logits_bf16 = jax.block_until_ready(
        mate_head_forward(seq_features, w1, b1, w2, b2, compute_dtype=jnp.bfloat16))
    assert jnp.allclose(logits_bf16.astype(jnp.float32), ref, atol=5e-2, rtol=5e-2)

    print("KERNEL_OK")
</pallas_src>

<mosaic_0001>
module attributes {stable_mosaic.version = 11 : i64} {
  func.func @_mate_head_kernel(%arg0: i32, %arg1: i32, %arg2: memref<16x32xf32, #tpu.memory_space<vmem>>, %arg3: memref<32x32xf32, #tpu.memory_space<vmem>>, %arg4: memref<1x32xf32, #tpu.memory_space<vmem>>, %arg5: memref<32x4xf32, #tpu.memory_space<vmem>>, %arg6: memref<1x4xf32, #tpu.memory_space<vmem>>, %arg7: memref<16x4xf32, #tpu.memory_space<vmem>>, %arg8: memref<16x4xf32, #tpu.memory_space<vmem>>) attributes {dimension_semantics = [#tpu.dimension_semantics<parallel>, #tpu.dimension_semantics<arbitrary>], iteration_bounds = array<i64: 1, 1>, scalar_prefetch = 0 : i64, scratch_operands = 1 : i64, tpu.core_type = #tpu.core_type<tc>, window_params = [{transform_indices = @transform_0, window_bounds = array<i64: 16, 32>}, {transform_indices = @transform_1, window_bounds = array<i64: 32, 32>}, {transform_indices = @transform_2, window_bounds = array<i64: 1, 32>}, {transform_indices = @transform_3, window_bounds = array<i64: 32, 4>}, {pipeline_mode = #tpu.pipeline_mode<synchronous>, transform_indices = @transform_4, window_bounds = array<i64: 1, 4>}, {transform_indices = @transform_5, window_bounds = array<i64: 16, 4>}]} {
    %c0_i32 = arith.constant 0 : i32
    %0 = arith.cmpi eq, %arg1, %c0_i32 : i32
    %1 = arith.extui %0 : i1 to i32
    %c0_i32_0 = arith.constant 0 : i32
    %2 = arith.cmpi ne, %1, %c0_i32_0 : i32
    scf.if %2 {
      %cst_16 = arith.constant 0.000000e+00 : f32
      %19 = vector.broadcast %cst_16 : f32 to vector<16x4xf32>
      %c0_17 = arith.constant 0 : index
      %c0_18 = arith.constant 0 : index
      %20 = vector.load %arg8[%c0_17, %c0_18] : memref<16x4xf32, #tpu.memory_space<vmem>>, vector<16x4xf32>
      tpu.vector_store %arg8[%c0_17, %c0_18], %19 {strides = array<i32>} : memref<16x4xf32, #tpu.memory_space<vmem>>, vector<16x4xf32>,
    } else {
    }
    %c0 = arith.constant 0 : index
    %c0_1 = arith.constant 0 : index
    %3 = vector.load %arg2[%c0, %c0_1] : memref<16x32xf32, #tpu.memory_space<vmem>>, vector<16x32xf32>
    %c0_2 = arith.constant 0 : index
    %c0_3 = arith.constant 0 : index
    %4 = vector.load %arg3[%c0_2, %c0_3] : memref<32x32xf32, #tpu.memory_space<vmem>>, vector<32x32xf32>
    %cst = arith.constant dense<0.000000e+00> : vector<16x32xf32>
    %5 = tpu.matmul %3, %4, %cst {dimension_numbers = #tpu.dot_dimension_numbers<[1], [0], [0], [1], [0, 0, 1, 1], [], []>} : vector<16x32xf32>, vector<32x32xf32>, vector<16x32xf32> -> vector<16x32xf32>
    %c0_4 = arith.constant 0 : index
    %c0_5 = arith.constant 0 : index
    %6 = vector.load %arg4[%c0_4, %c0_5] : memref<1x32xf32, #tpu.memory_space<vmem>>, vector<1x32xf32>
    %7 = vector.broadcast %6 : vector<1x32xf32> to vector<16x32xf32>
    %8 = arith.addf %5, %7 : vector<16x32xf32>
    %cst_6 = arith.constant 0.000000e+00 : f32
    %9 = vector.broadcast %cst_6 : f32 to vector<16x32xf32>
    %10 = arith.maximumf %8, %9 : vector<16x32xf32>
    %c0_7 = arith.constant 0 : index
    %c0_8 = arith.constant 0 : index
    %11 = vector.load %arg8[%c0_7, %c0_8] : memref<16x4xf32, #tpu.memory_space<vmem>>, vector<16x4xf32>
    %c0_9 = arith.constant 0 : index
    %c0_10 = arith.constant 0 : index
    %12 = vector.load %arg5[%c0_9, %c0_10] : memref<32x4xf32, #tpu.memory_space<vmem>>, vector<32x4xf32>
    %cst_11 = arith.constant dense<0.000000e+00> : vector<16x4xf32>
    %13 = tpu.matmul %10, %12, %cst_11 {dimension_numbers = #tpu.dot_dimension_numbers<[1], [0], [0], [1], [0, 0, 1, 1], [], []>} : vector<16x32xf32>, vector<32x4xf32>, vector<16x4xf32> -> vector<16x4xf32>
    %14 = arith.addf %11, %13 : vector<16x4xf32>
    %c0_12 = arith.constant 0 : index
    %c0_13 = arith.constant 0 : index
    %15 = vector.load %arg8[%c0_12, %c0_13] : memref<16x4xf32, #tpu.memory_space<vmem>>, vector<16x4xf32>
    tpu.vector_store %arg8[%c0_12, %c0_13], %14 {strides = array<i32>} : memref<16x4xf32, #tpu.memory_space<vmem>>, vector<16x4xf32>,
    %c0_i32_14 = arith.constant 0 : i32
    %16 = arith.cmpi eq, %arg1, %c0_i32_14 : i32
    %17 = arith.extui %16 : i1 to i32
    %c0_i32_15 = arith.constant 0 : i32
    %18 = arith.cmpi ne, %17, %c0_i32_15 : i32
    scf.if %18 {
      %c0_16 = arith.constant 0 : index
      %c0_17 = arith.constant 0 : index
      %19 = vector.load %arg8[%c0_16, %c0_17] : memref<16x4xf32, #tpu.memory_space<vmem>>, vector<16x4xf32>
      %c0_18 = arith.constant 0 : index
      %c0_19 = arith.constant 0 : index
      %20 = vector.load %arg6[%c0_18, %c0_19] : memref<1x4xf32, #tpu.memory_space<vmem>>, vector<1x4xf32>
      %21 = vector.broadcast %20 : vector<1x4xf32> to vector<16x4xf32>
      %22 = arith.addf %19, %21 : vector<16x4xf32>
      %c0_20 = arith.constant 0 : index
      %c0_21 = arith.constant 0 : index
      %23 = vector.load %arg7[%c0_20, %c0_21] : memref<16x4xf32, #tpu.memory_space<vmem>>, vector<16x4xf32>
      tpu.vector_store %arg7[%c0_20, %c0_21], %22 {strides = array<i32>} : memref<16x4xf32, #tpu.memory_space<vmem>>, vector<16x4xf32>,
    } else {
    }
    return
  }
  func.func @transform_0(%arg0: i32, %arg1: i32) -> (i32, i32) {
    %c0_i32 = arith.constant 0 : i32
    %c0_i32_0 = arith.constant 0 : i32
    return %arg0, %c0_i32 : i32, i32
  }
  func.func @transform_1(%arg0: i32, %arg1: i32) -> (i32, i32) {
    %c0_i32 = arith.constant 0 : i32
    %c0_i32_0 = arith.constant 0 : i32
    return %c0_i32, %arg1 : i32, i32
  }
  func.func @transform_2(%arg0: i32, %arg1: i32) -> (i32, i32) {
    %c0_i32 = arith.constant 0 : i32
    %c0_i32_0 = arith.constant 0 : i32
    return %c0_i32, %arg1 : i32, i32
  }
  func.func @transform_3(%arg0: i32, %arg1: i32) -> (i32, i32) {
    %c0_i32 = arith.constant 0 : i32
    %c0_i32_0 = arith.constant 0 : i32
    return %arg1, %c0_i32 : i32, i32
  }
  func.func @transform_4(%arg0: i32, %arg1: i32) -> (i32, i32) {
    %c0_i32 = arith.constant 0 : i32
    %c0_i32_0 = arith.constant 0 : i32
    %c0_i32_1 = arith.constant 0 : i32
    return %c0_i32, %c0_i32_0 : i32, i32
  }
  func.func @transform_5(%arg0: i32, %arg1: i32) -> (i32, i32) {
    %c0_i32 = arith.constant 0 : i32
    %c0_i32_0 = arith.constant 0 : i32
    return %arg0, %c0_i32 : i32, i32
  }
}

</mosaic_0001>

<bundles_post_ra>
// kernel: tpu_custom_call.1
= control target key start
LH: loop header
LB: loop body
LE: loop exit
PB: predicated region body
PF: predicated region fallthrough
CT: control target
= control target key end

     0   :  { %10 = vsyncpa [#allocation4], 0  ;;  %s187_s21 = smov [#allocation3]   ;;  %s188_s23 = smov 128   ;;  %s270_s0 = inlined_call_operand.hbm [shape: f32[16,32], index: 0, kind: input, shape index: {}]   ;;  %s271_s1 = inlined_call_operand.vmem [shape: f32[32,32], index: 1, kind: input, shape index: {}]   ;;  %s272_s2 = inlined_call_operand.vmem [shape: f32[1,32], index: 2, kind: input, shape index: {}]   ;;  %s273_s3 = inlined_call_operand.vmem [shape: f32[32,4], index: 3, kind: input, shape index: {}]   ;;  %s274_s4 = inlined_call_operand.vmem [shape: f32[1,4], index: 4, kind: input, shape index: {}]   ;;  %s275_s5 = inlined_call_operand.vmem [shape: f32[16,4], index: 5, kind: output, shape index: {}]  }
   0x1   :  { %s15_s20 = sshll.u32 %s270_s0, 4  ;;  %s17_s22 = sshll.u32 %s187_s21, 4  ;;  %s16_s20 = int_to_ptr.hbm [resolvable:$true] %s15_s20  ;;  %s18_s22 = int_to_ptr.vmem [resolvable:$true] %s17_s22 }
   0x2   :  { %s189_s24 = smov 8  }
   0x3   :  { %23 = dma.hbm_to_vmem [thread:$0]  %s16_s20, 256, %s18_s22, [#allocation4], %s188_s23, %s188_s23, %s189_s24  }
   0x4   :  { %185 = dma.done.wait [#allocation4], 256  }
   0x5   :  { %186 = vsyncadd [#allocation4], 4294967040  ;;  %v48_v0 = vld [vmem:[%s271_s1 + $0x18] sm:$0xff]  ;;  %v47_v1 = vld [vmem:[%s271_s1 + $0x10] sm:$0xff]  ;;  %vm53_vm0 = vcmask 261120   ;;  %vm40_vm1 = vcmask 31744  }
   0x6   :  { %147 = vmatpush.msra.mxu2 %v48_v0  ;;  %72 = vmatpush.msra.mxu0 %v48_v0  ;;  %v46_v2 = vld [vmem:[%s271_s1 + $0x8] sm:$0xff]  ;;  %v90_v3 = vld [vmem:[%s273_s3 + $0x18] sm:$0xff]  ;;  %v45_v4 = vld [vmem:[%s271_s1] sm:$0xff]  ;;  %v190_v10 = vmov 0.0  }
   0x7   :  { %151 = vmatpush.msra.mxu3 %v90_v3  ;;  %109 = vmatpush.msra.mxu1 %v90_v3  ;;  %v44_v5 = vld [vmem:[#allocation3 + $0x8] sm:$0xff]  ;;  %v43_v6 = vld [vmem:[#allocation3] sm:$0xff]  ;;  %v88_v8 = vld [vmem:[%s273_s3 + $0x8] sm:$0xff]  ;;  %41 = vst.msk [vmem:[#allocation2] sm:$0xff] %vm40_vm1, %v190_v10 }
   0x8   :  { %148 = vmatpush.msra.mxu2 %v47_v1  ;;  %73 = vmatpush.msra.mxu0 %v47_v1  ;;  %v89_v7 = vld [vmem:[%s273_s3 + $0x10] sm:$0xff]  ;;  %v87_v9 = vld [vmem:[%s273_s3] sm:$0xff]  ;;  %42 = vst.msk [vmem:[#allocation2 + $0x8] sm:$0xff] %vm40_vm1, %v190_v10 }
   0x9   :  { %152 = vmatpush.msra.mxu3 %v89_v7  ;;  %110 = vmatpush.msra.mxu1 %v89_v7  ;;  %v159_v11 = vld [vmem:[%s272_s2] ss:$0 sm:$0xff] }
   0xa   :  { %149 = vmatpush.msra.mxu2 %v46_v2  ;;  %74 = vmatpush.msra.mxu0 %v46_v2  ;;  %v160_v21 = vld [vmem:[%s274_s4] ss:$0 sm:$0xff] }
   0xb   :  { %153 = vmatpush.msra.mxu3 %v88_v8  ;;  %111 = vmatpush.msra.mxu1 %v88_v8 }
   0xc   :  { %150 = vmatpush.msra.mxu2 %v45_v4  ;;  %75 = vmatpush.msra.mxu0 %v45_v4 }
   0xd   :  { %144 = vmatmul.msk.f32.vlgmr.msra.gmra.mxu2 %vm53_vm0, %v44_v5  ;;  %143 = vmatmul.msk.f32.vlgmr.msra.gmra.mxu0 %vm53_vm0, %v43_v6 }
   0xe   :  { %154 = vmatpush.msra.mxu3 %v87_v9  ;;  %112 = vmatpush.msra.mxu1 %v87_v9  ;;  %v85_v18 = vld [vmem:[#allocation2] sm:$0xff] }
   0xf   :  { %v86_v23 = vld [vmem:[#allocation2 + $0x8] sm:$0xff] }
  0x8a   :  { %v77_v12 = vpop.f32.mrf.mxu0 }
  0x8b   :  { %v78_v13 = vadd.f32 %v159_v11, %v77_v12 }
  0x8d   :  { %v83_v14 = vmax.f32 %v78_v13, 0.0 }
  0x8f   :  { %145 = vmatmul.msk.f32.vlgmr.msra.gmra.mxu1 %vm53_vm0, %v83_v14 }
  0x90   :  { %v80_v15 = vpop.f32.mrf.mxu2 }
  0x91   :  { %v81_v16 = vadd.f32 %v159_v11, %v80_v15 }
  0x93   :  { %v84_v17 = vmax.f32 %v81_v16, 0.0 }
  0x95   :  { %146 = vmatmul.msk.f32.vlgmr.msra.gmra.mxu3 %vm53_vm0, %v84_v17 }
 0x10c   :  { %v114_v19 = vpop.f32.mrf.mxu1 }
 0x10d   :  { %v120_v20 = vadd.f32 %v114_v19, %v85_v18 }
 0x10f   :  { %123 = vst.msk [vmem:[#allocation2] sm:$0xff] %vm40_vm1, %v120_v20 }
 0x116   :  { %v128_v22 = vld [vmem:[#allocation2] sm:$0xff] }
 0x117   :  { %v134_v24 = vadd.f32 %v160_v21, %v128_v22 }
 0x118   :  { %v117_v25 = vpop.f32.mrf.mxu3 }
 0x119   :  { %136 = vst.msk [vmem:[%s275_s5] sm:$0xff] %vm40_vm1, %v134_v24  ;;  %v121_v26 = vadd.f32 %v117_v25, %v86_v23 }
 0x11b   :  { %124 = vst.msk [vmem:[#allocation2 + $0x8] sm:$0xff] %vm40_vm1, %v121_v26 }
 0x122   :  { %v129_v27 = vld [vmem:[#allocation2 + $0x8] sm:$0xff] }
 0x123   :  { %v135_v28 = vadd.f32 %v160_v21, %v129_v27 }
 0x125   :  { %137 = vst.msk [vmem:[%s275_s5 + $0x8] sm:$0xff] %vm40_vm1, %v135_v28 }
 0x126   :  { %142 = vsyncpa [#allocation4], 1 }

</bundles_post_ra>
